<compile_context>
chip_gen: v6e
topology: v6e:2x2x1
jax: 0.10.0
libtpu: 0.0.40
codegen_flags: <defaults>
</compile_context>

<pallas_src>
import functools

import jax
import jax.numpy as jnp
from jax import lax
from jax.experimental import pallas as pl
from jax.experimental.pallas import tpu as pltpu


# --------------------------------------------------------------------------- #
# Kernels
# --------------------------------------------------------------------------- #

def _se2_fused_kernel(x_ref, w1_ref, w2_ref, o_ref, *, true_hw, chunk):
    """Primary path: block = (bb, C, HWp) batch rows, everything in one kernel.

    The block is swept three times out of VMEM (mean, centered SSQ, scale) in
    `chunk`-lane slices so f32 temporaries stay ~chunk-sized instead of
    block-sized (critical for bf16 inputs and v7x's 64 MiB VMEM).
    """
    bb, c, hwp = x_ref.shape
    n_chunks = hwp // chunk               # chunk always divides hwp (picker)
    unroll = n_chunks <= 8
    need_mask = true_hw != hwp            # zero lane-padding present?

    # ---- pass 1: sum -> mean (zero padding does not change the sum) -------
    def p1(i, acc):
        start = pl.multiple_of(i * chunk, chunk)
        xc = x_ref[:, :, pl.ds(start, chunk)].astype(jnp.float32)
        return acc + jnp.sum(xc, axis=-1)

    s1 = lax.fori_loop(0, n_chunks, p1, jnp.zeros((bb, c), jnp.float32),
                       unroll=unroll)
    mean = s1 * jnp.float32(1.0 / true_hw)
    mean3 = mean[:, :, None]              # hoisted broadcast

    # ---- pass 2: centered sum of squares (two-pass std, no cancellation) --
    def p2(i, acc):
        start = pl.multiple_of(i * chunk, chunk)
        xc = x_ref[:, :, pl.ds(start, chunk)].astype(jnp.float32)
        d = xc - mean3
        d2 = d * d
        if need_mask:
            idx = lax.broadcasted_iota(jnp.int32, d2.shape, 2) + start
            d2 = jnp.where(idx < true_hw, d2, 0.0)
        return acc + jnp.sum(d2, axis=-1)

    ss = lax.fori_loop(0, n_chunks, p2, jnp.zeros((bb, c), jnp.float32),
                       unroll=unroll)
    # torch.std default: unbiased /(N-1).  N == 1 yields NaN, same as torch.
    y = jnp.sqrt(ss / jnp.float32(true_hw - 1))               # (bb, C)

    # ---- gate: FC -> ReLU -> FC -> sigmoid (tiny; MXU path is noise) ------
    h = jnp.maximum(
        jnp.dot(y, w1_ref[...], preferred_element_type=jnp.float32), 0.0)
    g = jax.nn.sigmoid(
        jnp.dot(h, w2_ref[...], preferred_element_type=jnp.float32))
    gate = g.astype(x_ref.dtype)[:, :, None]                  # hoisted cast/broadcast

    # ---- pass 3: chunked scale-and-store in the input dtype ---------------
    @pl.loop(0, n_chunks)
    def _(i):
        start = pl.multiple_of(i * chunk, chunk)
        o_ref[:, :, pl.ds(start, chunk)] = (
            x_ref[:, :, pl.ds(start, chunk)] * gate).astype(o_ref.dtype)


def _se2_reduce_kernel(x_ref, w1_ref, w2_ref, gate_ref, s1_ref, s2_ref,
                       *, true_hw, chunk):
    """HW-tiled fallback, pass A: accumulate s1/s2 over the HW grid axis, then
    compute std -> FC -> sigmoid gate at the last HW block.

    Single-pass (s1, s2) formula with f32 accumulators (block-local two-pass
    is impossible once HW is tiled over HBM); clamped at 0 before sqrt.
    """
    hwi = pl.program_id(1)

    @pl.when(hwi == 0)
    def _init():
        s1_ref[...] = jnp.zeros_like(s1_ref)
        s2_ref[...] = jnp.zeros_like(s2_ref)

    hw_blk = x_ref.shape[-1]
    n_chunks = hw_blk // chunk
    base = hwi * hw_blk

    def body(i, carry):
        a1, a2 = carry
        start = pl.multiple_of(i * chunk, chunk)
        xc = x_ref[:, :, pl.ds(start, chunk)].astype(jnp.float32)
        idx = lax.broadcasted_iota(jnp.int32, xc.shape, 2) + (base + start)
        xc = jnp.where(idx < true_hw, xc, 0.0)     # mask pad / ragged tail
        return a1 + jnp.sum(xc, axis=-1), a2 + jnp.sum(xc * xc, axis=-1)

    zero = jnp.zeros(s1_ref.shape, jnp.float32)
    p1, p2 = lax.fori_loop(0, n_chunks, body, (zero, zero),
                           unroll=n_chunks <= 8)
    s1_ref[...] += p1
    s2_ref[...] += p2

    @pl.when(hwi == pl.num_programs(1) - 1)
    def _finalize():
        n = jnp.float32(true_hw)
        var = (s2_ref[...] - s1_ref[...] * s1_ref[...] / n) / jnp.float32(true_hw - 1)
        y = jnp.sqrt(jnp.maximum(var, 0.0))                    # (1, C)
        h = jnp.maximum(
            jnp.dot(y, w1_ref[...], preferred_element_type=jnp.float32), 0.0)
        g = jax.nn.sigmoid(
            jnp.dot(h, w2_ref[...], preferred_element_type=jnp.float32))
        gate_ref[...] = g[:, :, None]                          # (1, C, 1)


def _se2_scale_kernel(gate_ref, x_ref, o_ref):
    """HW-tiled fallback, pass B: out = x * gate (streaming, lane-dense)."""
    o_ref[...] = (x_ref[...] * gate_ref[...].astype(x_ref.dtype)).astype(o_ref.dtype)


# --------------------------------------------------------------------------- #
# Tiling helpers
# --------------------------------------------------------------------------- #

def _vmem_capacity_bytes():
    """Per-TensorCore VMEM; conservative v7x default if the query fails."""
    try:
        info = pltpu.get_tpu_info()
        for name in ("vmem_capacity_bytes", "vmem_bytes", "vmem_size_bytes"):
            v = getattr(info, name, None)
            if v:
                return int(v)
    except Exception:
        pass
    return 64 << 20


def _pick_batch_block(b, per_row_bytes, budget):
    """Batch rows per grid step.

    - never exceed the VMEM block budget,
    - target >= 8 grid steps (>= 4 per v7x TensorCore) when B permits,
    - keep blocks >= ~1 MiB so the ~0.35us/step overhead stays negligible
      (the 1 MiB floor only wins for tiny problems, where it doesn't matter).
    """
    bb_cap = max(1, budget // per_row_bytes)
    bb_steps = pl.cdiv(b, min(8, b))
    bb_floor = max(1, (1 << 20) // per_row_bytes)
    return max(1, min(b, bb_cap, max(bb_steps, bb_floor)))


def _pick_chunk(hwp, rows, max_temp_bytes=2 << 20):
    """Largest multiple-of-128 divisor of hwp keeping f32 chunk temporaries
    (rows x chunk x 4B) under ~max_temp_bytes.  128 always divides hwp."""
    limit = max(128, max_temp_bytes // max(rows * 4, 1))
    if hwp <= limit:
        return hwp
    best = 128
    for cand in range(128, min(hwp, limit) + 1, 128):
        if hwp % cand == 0:
            best = cand
    return best


# --------------------------------------------------------------------------- #
# Wrapper
# --------------------------------------------------------------------------- #

def _se2_batched(x3, w1, w2, true_hw, budget, vmem_limit, cost):
    b, c, hwp = x3.shape
    cr = w1.shape[1]
    itemsize = jnp.dtype(x3.dtype).itemsize
    per_row = c * hwp * itemsize

    bb = _pick_batch_block(b, per_row, budget)
    grid_b = pl.cdiv(b, bb)                       # ragged last block allowed
    chunk = _pick_chunk(hwp, bb * c)

    kernel = functools.partial(_se2_fused_kernel, true_hw=true_hw, chunk=chunk)
    return pl.pallas_call(
        kernel,
        out_shape=jax.ShapeDtypeStruct((b, c, hwp), x3.dtype),
        grid_spec=pltpu.PrefetchScalarGridSpec(
            num_scalar_prefetch=0,
            grid=(grid_b,),
            in_specs=[
                pl.BlockSpec((bb, c, hwp), lambda i: (i, 0, 0)),   # x rows
                pl.BlockSpec((c, cr), lambda i: (0, 0)),           # W1 (resident)
                pl.BlockSpec((cr, c), lambda i: (0, 0)),           # W2 (resident)
            ],
            out_specs=pl.BlockSpec((bb, c, hwp), lambda i: (i, 0, 0)),
        ),
        compiler_params=pltpu.CompilerParams(
            dimension_semantics=("parallel",),
            vmem_limit_bytes=vmem_limit,
        ),
        cost_estimate=cost,
    )(x3, w1, w2)


def _se2_hw_tiled(x3, w1, w2, true_hw, budget, vmem_limit, cost):
    """Fallback when a single (C, HWp) row exceeds the block budget."""
    b, c, hwp = x3.shape
    cr = w1.shape[1]
    itemsize = jnp.dtype(x3.dtype).itemsize

    hw_blk = max(128, (budget // (c * itemsize)) // 128 * 128)
    hw_blk = min(hw_blk, hwp)
    grid_hw = pl.cdiv(hwp, hw_blk)
    chunk = _pick_chunk(hw_blk, c)

    reduce_kernel = functools.partial(_se2_reduce_kernel,
                                      true_hw=true_hw, chunk=chunk)
    gate = pl.pallas_call(
        reduce_kernel,
        out_shape=jax.ShapeDtypeStruct((b, c, 1), jnp.float32),
        grid_spec=pltpu.PrefetchScalarGridSpec(
            num_scalar_prefetch=0,
            grid=(b, grid_hw),
            in_specs=[
                pl.BlockSpec((1, c, hw_blk), lambda bi, hi: (bi, 0, hi)),
                pl.BlockSpec((c, cr), lambda bi, hi: (0, 0)),
                pl.BlockSpec((cr, c), lambda bi, hi: (0, 0)),
            ],
            out_specs=pl.BlockSpec((1, c, 1), lambda bi, hi: (bi, 0, 0)),
            scratch_shapes=[pltpu.VMEM((1, c), jnp.float32),
                            pltpu.VMEM((1, c), jnp.float32)],
        ),
        compiler_params=pltpu.CompilerParams(
            dimension_semantics=("parallel", "arbitrary"),
            vmem_limit_bytes=vmem_limit,
        ),
    )(x3, w1, w2)

    return pl.pallas_call(
        _se2_scale_kernel,
        out_shape=jax.ShapeDtypeStruct((b, c, hwp), x3.dtype),
        grid_spec=pltpu.PrefetchScalarGridSpec(
            num_scalar_prefetch=0,
            grid=(b, grid_hw),
            in_specs=[
                pl.BlockSpec((1, c, 1), lambda bi, hi: (bi, 0, 0)),
                pl.BlockSpec((1, c, hw_blk), lambda bi, hi: (bi, 0, hi)),
            ],
            out_specs=pl.BlockSpec((1, c, hw_blk), lambda bi, hi: (bi, 0, hi)),
        ),
        compiler_params=pltpu.CompilerParams(
            dimension_semantics=("parallel", "parallel"),
            vmem_limit_bytes=vmem_limit,
        ),
        cost_estimate=cost,
    )(gate, x3)


def se2_layer(x, w1, w2, *, block_budget_bytes=None):
    """x: (B, C, H, W); w1: (C, C//r); w2: (C//r, C).  Returns (B, C, H, W)."""
    b, c, h, w = x.shape
    hw = h * w
    itemsize = jnp.dtype(x.dtype).itemsize

    # Lane-dense spatial axis: pad H*W up to a multiple of 128.  The kernels
    # use the true element count for mean/std and mask the pad explicitly.
    hwp = ((hw + 127) // 128) * 128
    x3 = x.reshape(b, c, hw)
    if hwp != hw:
        x3 = jnp.pad(x3, ((0, 0), (0, 0), (0, hwp - hw)))

    # Generation-aware budgets: 128-MiB-VMEM chips (v5e/v6e) get big blocks;
    # v7x-class (64 MiB per TensorCore) gets ~5 MiB blocks and a lower cap.
    cap = _vmem_capacity_bytes()
    if block_budget_bytes is None:
        block_budget_bytes = (16 << 20) if cap >= (96 << 20) else (5 << 20)
    vmem_limit = int(min(100 << 20, (cap * 3) // 4))

    cost = pl.CostEstimate(
        flops=int(4 * b * c * hw + 4 * b * c * w1.shape[1]),
        transcendentals=int(2 * b * c),                 # sqrt + sigmoid per (b, c)
        bytes_accessed=int(2 * b * c * hw * itemsize
                           + (w1.size + w2.size) * jnp.dtype(w1.dtype).itemsize),
    )

    per_row = c * hwp * itemsize
    if per_row <= block_budget_bytes:
        out3 = _se2_batched(x3, w1, w2, hw, block_budget_bytes, vmem_limit, cost)
    else:
        out3 = _se2_hw_tiled(x3, w1, w2, hw, block_budget_bytes, vmem_limit, cost)

    if hwp != hw:
        out3 = out3[:, :, :hw]
    return out3.reshape(b, c, h, w)


# --------------------------------------------------------------------------- #
# Reference + test
# --------------------------------------------------------------------------- #

def _reference(x, w1, w2):
    b, c, h, w = x.shape
    y = jnp.std(x.reshape(b, c, -1).astype(jnp.float32), axis=-1, ddof=1)
    y = jnp.maximum(y @ w1, 0.0)
    y = jax.nn.sigmoid(y @ w2)
    return x * y.astype(x.dtype)[:, :, None, None]


if __name__ == "__main__":
    key = jax.random.PRNGKey(0)
    kx, k1, k2, kx2 = jax.random.split(key, 4)

    # Small shapes consistent with SE2Layer (channel divisible by reduction).
    B, C, H, W = 4, 32, 16, 16
    reduction = 16
    Cr = C // reduction

    w1 = jax.random.normal(k1, (C, Cr), dtype=jnp.float32) * 0.1   # fc[0].weight.T
    w2 = jax.random.normal(k2, (Cr, C), dtype=jnp.float32) * 0.1   # fc[2].weight.T

    # 1) Primary path: lane-aligned H*W, batched blocks.
    x = jax.random.normal(kx, (B, C, H, W), dtype=jnp.float32) + 1.0
    out = jax.block_until_ready(se2_layer(x, w1, w2))
    ref = _reference(x, w1, w2)
    assert out.shape == (B, C, H, W)
    assert jnp.allclose(out, ref, atol=1e-4, rtol=1e-4), "mismatch (primary path)"

    # 2) Unaligned H*W (12x12 -> padded to 256 lanes) + ragged batch blocks
    #    (budget forced small so bb=2 and the last block is partial).
    x2 = jax.random.normal(kx2, (5, C, 12, 12), dtype=jnp.float32) + 1.0
    out2 = jax.block_until_ready(se2_layer(x2, w1, w2, block_budget_bytes=80 * 1024))
    ref2 = _reference(x2, w1, w2)
    assert jnp.allclose(out2, ref2, atol=1e-4, rtol=1e-4), "mismatch (padded/ragged)"

    # 3) HW-tiled two-kernel fallback (budget below one (C, HW) row).
    out3 = jax.block_until_ready(se2_layer(x2, w1, w2, block_budget_bytes=16 * 1024))
    assert jnp.allclose(out3, ref2, atol=1e-3, rtol=1e-3), "mismatch (hw-tiled)"

    print("KERNEL_OK")
</pallas_src>

<mosaic_0001>
module attributes {stable_mosaic.version = 11 : i64} {
  func.func @_se2_fused_kernel(%arg0: i32, %arg1: memref<4x32x256xf32, #tpu.memory_space<vmem>>, %arg2: memref<32x2xf32, #tpu.memory_space<vmem>>, %arg3: memref<2x32xf32, #tpu.memory_space<vmem>>, %arg4: memref<4x32x256xf32, #tpu.memory_space<vmem>>) attributes {dimension_semantics = [#tpu.dimension_semantics<parallel>], iteration_bounds = array<i64: 1>, scalar_prefetch = 0 : i64, scratch_operands = 0 : i64, tpu.core_type = #tpu.core_type<tc>, window_params = [{transform_indices = @transform_0, window_bounds = array<i64: 4, 32, 256>}, {pipeline_mode = #tpu.pipeline_mode<synchronous>, transform_indices = @transform_1, window_bounds = array<i64: 32, 2>}, {pipeline_mode = #tpu.pipeline_mode<synchronous>, transform_indices = @transform_2, window_bounds = array<i64: 2, 32>}, {transform_indices = @transform_3, window_bounds = array<i64: 4, 32, 256>}]} {
    %cst = arith.constant 0.000000e+00 : f32
    %0 = vector.broadcast %cst : f32 to vector<4x32xf32>
    %c0_i32 = arith.constant 0 : i32
    %c256_i32 = arith.constant 256 : i32
    %1 = arith.muli %c0_i32, %c256_i32 : i32
    %2 = tpu.assume_multiple %1, 256 : i32
    %c0 = arith.constant 0 : index
    %c0_0 = arith.constant 0 : index
    %3 = arith.index_cast %2 : i32 to index
    %4 = vector.load %arg1[%c0, %c0_0, %3] : memref<4x32x256xf32, #tpu.memory_space<vmem>>, vector<4x32x256xf32>
    %cst_1 = arith.constant dense<0.000000e+00> : vector<4x32xf32>
    %5 = vector.multi_reduction <add>, %4, %cst_1 [2] : vector<4x32x256xf32> to vector<4x32xf32>
    %6 = arith.addf %0, %5 : vector<4x32xf32>
    %c1_i32 = arith.constant 1 : i32
    %cst_2 = arith.constant 3.906250e-03 : f32
    %7 = vector.broadcast %cst_2 : f32 to vector<4x32xf32>
    %8 = arith.mulf %6, %7 : vector<4x32xf32>
    %9 = vector.shape_cast %8 : vector<4x32xf32> to vector<4x32x1xf32>
    %cst_3 = arith.constant 0.000000e+00 : f32
    %10 = vector.broadcast %cst_3 : f32 to vector<4x32xf32>
    %c0_i32_4 = arith.constant 0 : i32
    %c256_i32_5 = arith.constant 256 : i32
    %11 = arith.muli %c0_i32_4, %c256_i32_5 : i32
    %12 = tpu.assume_multiple %11, 256 : i32
    %c0_6 = arith.constant 0 : index
    %c0_7 = arith.constant 0 : index
    %13 = arith.index_cast %12 : i32 to index
    %14 = vector.load %arg1[%c0_6, %c0_7, %13] : memref<4x32x256xf32, #tpu.memory_space<vmem>>, vector<4x32x256xf32>
    %15 = vector.broadcast %9 : vector<4x32x1xf32> to vector<4x32x256xf32>
    %16 = arith.subf %14, %15 : vector<4x32x256xf32>
    %17 = arith.mulf %16, %16 : vector<4x32x256xf32>
    %cst_8 = arith.constant dense<0.000000e+00> : vector<4x32xf32>
    %18 = vector.multi_reduction <add>, %17, %cst_8 [2] : vector<4x32x256xf32> to vector<4x32xf32>
    %19 = arith.addf %10, %18 : vector<4x32xf32>
    %c1_i32_9 = arith.constant 1 : i32
    %cst_10 = arith.constant 2.550000e+02 : f32
    %20 = vector.broadcast %cst_10 : f32 to vector<4x32xf32>
    %21 = arith.divf %19, %20 : vector<4x32xf32>
    %22 = math.sqrt %21 : vector<4x32xf32>
    %c0_11 = arith.constant 0 : index
    %c0_12 = arith.constant 0 : index
    %23 = vector.load %arg2[%c0_11, %c0_12] : memref<32x2xf32, #tpu.memory_space<vmem>>, vector<32x2xf32>
    %cst_13 = arith.constant dense<0.000000e+00> : vector<4x2xf32>
    %24 = tpu.matmul %22, %23, %cst_13 {dimension_numbers = #tpu.dot_dimension_numbers<[1], [0], [0], [1], [0, 0, 1, 1], [], []>} : vector<4x32xf32>, vector<32x2xf32>, vector<4x2xf32> -> vector<4x2xf32>
    %cst_14 = arith.constant 0.000000e+00 : f32
    %25 = vector.broadcast %cst_14 : f32 to vector<4x2xf32>
    %26 = arith.maximumf %24, %25 : vector<4x2xf32>
    %c0_15 = arith.constant 0 : index
    %c0_16 = arith.constant 0 : index
    %27 = vector.load %arg3[%c0_15, %c0_16] : memref<2x32xf32, #tpu.memory_space<vmem>>, vector<2x32xf32>
    %cst_17 = arith.constant dense<0.000000e+00> : vector<4x32xf32>
    %28 = tpu.matmul %26, %27, %cst_17 {dimension_numbers = #tpu.dot_dimension_numbers<[1], [0], [0], [1], [0, 0, 1, 1], [], []>} : vector<4x2xf32>, vector<2x32xf32>, vector<4x32xf32> -> vector<4x32xf32>
    %29 = arith.negf %28 : vector<4x32xf32>
    %30 = math.exp %29 : vector<4x32xf32>
    %cst_18 = arith.constant 1.000000e+00 : f32
    %31 = vector.broadcast %cst_18 : f32 to vector<4x32xf32>
    %32 = arith.addf %31, %30 : vector<4x32xf32>
    %33 = arith.divf %31, %32 : vector<4x32xf32>
    %34 = vector.shape_cast %33 : vector<4x32xf32> to vector<4x32x1xf32>
    %c0_i32_19 = arith.constant 0 : i32
    %c1_i32_20 = arith.constant 1 : i32
    %35 = arith.muli %c0_i32_19, %c1_i32_20 : i32
    %c0_i32_21 = arith.constant 0 : i32
    %36 = arith.addi %c0_i32_21, %35 : i32
    %c256_i32_22 = arith.constant 256 : i32
    %37 = arith.muli %36, %c256_i32_22 : i32
    %38 = tpu.assume_multiple %37, 256 : i32
    %c0_23 = arith.constant 0 : index
    %c0_24 = arith.constant 0 : index
    %39 = arith.index_cast %38 : i32 to index
    %40 = vector.load %arg1[%c0_23, %c0_24, %39] : memref<4x32x256xf32, #tpu.memory_space<vmem>>, vector<4x32x256xf32>
    %41 = vector.broadcast %34 : vector<4x32x1xf32> to vector<4x32x256xf32>
    %42 = arith.mulf %40, %41 : vector<4x32x256xf32>
    %c0_25 = arith.constant 0 : index
    %c0_26 = arith.constant 0 : index
    %43 = arith.index_cast %38 : i32 to index
    %44 = vector.load %arg4[%c0_25, %c0_26, %43] : memref<4x32x256xf32, #tpu.memory_space<vmem>>, vector<4x32x256xf32>
    tpu.vector_store %arg4[%c0_25, %c0_26, %43], %42 {strides = array<i32>} : memref<4x32x256xf32, #tpu.memory_space<vmem>>, vector<4x32x256xf32>,
    %c1_i32_27 = arith.constant 1 : i32
    return
  }
  func.func @transform_0(%arg0: i32) -> (i32, i32, i32) {
    %c0_i32 = arith.constant 0 : i32
    %c0_i32_0 = arith.constant 0 : i32
    %c0_i32_1 = arith.constant 0 : i32
    return %arg0, %c0_i32, %c0_i32_0 : i32, i32, i32
  }
  func.func @transform_1(%arg0: i32) -> (i32, i32) {
    %c0_i32 = arith.constant 0 : i32
    %c0_i32_0 = arith.constant 0 : i32
    %c0_i32_1 = arith.constant 0 : i32
    return %c0_i32, %c0_i32_0 : i32, i32
  }
  func.func @transform_2(%arg0: i32) -> (i32, i32) {
    %c0_i32 = arith.constant 0 : i32
    %c0_i32_0 = arith.constant 0 : i32
    %c0_i32_1 = arith.constant 0 : i32
    return %c0_i32, %c0_i32_0 : i32, i32
  }
  func.func @transform_3(%arg0: i32) -> (i32, i32, i32) {
    %c0_i32 = arith.constant 0 : i32
    %c0_i32_0 = arith.constant 0 : i32
    %c0_i32_1 = arith.constant 0 : i32
    return %arg0, %c0_i32, %c0_i32_0 : i32, i32, i32
  }
}

</mosaic_0001>

<bundles_post_ra>
// kernel: tpu_custom_call.1
= control target key start
LH: loop header
LB: loop body
LE: loop exit
PB: predicated region body
PF: predicated region fallthrough
CT: control target
= control target key end

     0   :  { %8 = vsyncpa [#allocation3], 0  ;;  %s1408_s0 = inlined_call_operand.hbm [shape: f32[4,32,256], index: 0, kind: input, shape index: {}]   ;;  %s1409_s1 = inlined_call_operand.vmem [shape: f32[32,2], index: 1, kind: input, shape index: {}]   ;;  %s1410_s2 = inlined_call_operand.vmem [shape: f32[2,32], index: 2, kind: input, shape index: {}]   ;;  %s1411_s3 = inlined_call_operand.hbm [shape: f32[4,32,256], index: 3, kind: output, shape index: {}]  }
   0x1   :  { %9 = vsyncpa [#allocation4], 0  ;;  %s937_s12 = smov [#allocation2]  }
   0x2   :  { %s15_s13 = sshll.u32 %s937_s12, 4  ;;  %s16_s13 = int_to_ptr.vmem [resolvable:$true] %s15_s13 }
   0x3   :  { %s901_s14 = scalar_lea.vmem %s16_s13, 4096  ;;  %p906_p1 = scmp.lt.s32.totalorder %s16_s13, %s16_s13 }
   0x4   :  { %p902_p0 = scmp.ne.s32.totalorder %s16_s13, %s901_s14  ;;  %p907_p2 = scmp.lt.s32.totalorder %s901_s14, %s901_s14 }
   0x6   :  { %p908_p3 = por %p907_p2, %p906_p1 }
   0x8   :  { %p909_p4 = pnand %p908_p3, %p902_p0 }
   0xa   :  { %912 = shalt.err (!%p909_p4)
}
   0xb   :  { %s938_s15 = smov 256   ;;  %s939_s16 = smov 16  }
   0xc   :  { %21 = dma.hbm_to_vmem [thread:$0]  %s1408_s0, 4096, %s16_s13, [#allocation3], %s938_s15, %s938_s15, %s939_s16  }
   0xd   :  { %933 = dma.done.wait [#allocation3], 4096  }
   0xe   :  { %934 = vsyncadd [#allocation3], 4294963200  ;;  %v969_v0 = vld [vmem:[#allocation2] sm:$0xff]  ;;  %v971_v1 = vld [vmem:[#allocation2 + $0x8] sm:$0xff]  ;;  %vm941_vm0 = vmmov 0  }
   0xf   :  { %v973_v2 = vld [vmem:[#allocation2 + $0x40] sm:$0xff]  ;;  %v61_v3 = vadd.f32 %v971_v1, %v969_v0  ;;  %v977_v4 = vld [vmem:[#allocation2 + $0x48] sm:$0xff]  ;;  %v979_v5 = vld [vmem:[#allocation2 + $0x10] sm:$0xff] }
  0x10   :  { %v981_v6 = vld [vmem:[#allocation2 + $0x18] sm:$0xff]  ;;  %v73_v7 = vadd.f32 %v977_v4, %v973_v2  ;;  %v985_v8 = vld [vmem:[#allocation2 + $0x50] sm:$0xff]  ;;  %v993_v12 = vld [vmem:[#allocation2 + $0x20] sm:$0xff] }
  0x11   :  { %v987_v9 = vld [vmem:[#allocation2 + $0x58] sm:$0xff]  ;;  %62 = vadd.xlane.f32.xlu0 %v61_v3  ;;  %v64_v10 = vadd.f32 %v981_v6, %v979_v5  ;;  %v995_v13 = vld [vmem:[#allocation2 + $0x28] sm:$0xff]  ;;  %v997_v14 = vld [vmem:[#allocation2 + $0x60] sm:$0xff] }
  0x12   :  { %74 = vadd.xlane.f32.xlu1 %v73_v7  ;;  %v76_v11 = vadd.f32 %v987_v9, %v985_v8  ;;  %v999_v15 = vld [vmem:[#allocation2 + $0x68] sm:$0xff]  ;;  %v67_v16 = vadd.f32 %v995_v13, %v993_v12  ;;  %v1005_v18 = vld [vmem:[#allocation2 + $0x80] sm:$0xff]  ;;  %v1009_v20 = vld [vmem:[#allocation2 + $0x90] sm:$0xff] }
  0x13   :  { %v79_v17 = vadd.f32 %v999_v15, %v997_v14  ;;  %v1007_v19 = vld [vmem:[#allocation2 + $0x88] sm:$0xff]  ;;  %v1011_v21 = vld [vmem:[#allocation2 + $0x98] sm:$0xff]  ;;  %v1017_v24 = vld [vmem:[#allocation2 + $0x30] sm:$0xff] }
  0x14   :  { %1423 = vst [vmem:[#allocation8_spill] sm:$0xff] %v1011_v21  ;;  %v85_v22 = vadd.f32 %v1007_v19, %v1005_v18  ;;  %v88_v23 = vadd.f32 %v1011_v21, %v1009_v20  ;;  %v1019_v25 = vld [vmem:[#allocation2 + $0x38] sm:$0xff]  ;;  %v1021_v26 = vld [vmem:[#allocation2 + $0x70] sm:$0xff]  ;;  %v1029_v30 = vld [vmem:[#allocation2 + $0xa0] sm:$0xff] }
  0x15   :  { %65 = vadd.xlane.f32.xlu0 %v64_v10  ;;  %v1023_v27 = vld [vmem:[#allocation2 + $0x78] sm:$0xff]  ;;  %v70_v28 = vadd.f32 %v1019_v25, %v1017_v24  ;;  %v1031_v31 = vld [vmem:[#allocation2 + $0xa8] sm:$0xff]  ;;  %v1033_v32 = vld [vmem:[#allocation2 + $0xc0] sm:$0xff] }
  0x16   :  { %77 = vadd.xlane.f32.xlu1 %v76_v11  ;;  %v82_v29 = vadd.f32 %v1023_v27, %v1021_v26  ;;  %1424 = vst [vmem:[#allocation9_spill] sm:$0xff] %v1033_v32  ;;  %v1035_v33 = vld [vmem:[#allocation2 + $0xc8] sm:$0xff]  ;;  %v91_v34 = vadd.f32 %v1031_v31, %v1029_v30  ;;  %v1041_v36 = vld [vmem:[#allocation2 + $0xd0] sm:$0xff]  ;;  %v1043_v37 = vld [vmem:[#allocation2 + $0xd8] sm:$0xff] }
  0x17   :  { %1425 = vst [vmem:[#allocation10_spill] sm:$0xff] %v1035_v33  ;;  %v97_v35 = vadd.f32 %v1035_v33, %v1033_v32  ;;  %1426 = vst [vmem:[#allocation11_spill] sm:$0xff] %v1041_v36  ;;  %v1045_v38 = vld [vmem:[#allocation2 + $0xb0] sm:$0xff]  ;;  %v1047_v39 = vld [vmem:[#allocation2 + $0xb8] sm:$0xff]  ;;  %v100_v40 = vadd.f32 %v1043_v37, %v1041_v36 }
  0x18   :  { %1427 = vst [vmem:[#allocation12_spill] sm:$0xff] %v1043_v37  ;;  %1428 = vst [vmem:[#allocation13_spill] sm:$0xff] %v1045_v38  ;;  %v94_v41 = vadd.f32 %v1047_v39, %v1045_v38  ;;  %v1053_v42 = vld [vmem:[#allocation2 + $0xe0] sm:$0xff]  ;;  %v1055_v43 = vld [vmem:[#allocation2 + $0xe8] sm:$0xff] }
  0x19   :  { %68 = vadd.xlane.f32.xlu0 %v67_v16  ;;  %1429 = vst [vmem:[#allocation14_spill] sm:$0xff] %v1047_v39  ;;  %1430 = vst [vmem:[#allocation15_spill] sm:$0xff] %v1053_v42  ;;  %v1057_v44 = vld [vmem:[#allocation2 + $0xf0] sm:$0xff]  ;;  %v1059_v45 = vld [vmem:[#allocation2 + $0xf8] sm:$0xff]  ;;  %v103_v46 = vadd.f32 %v1055_v43, %v1053_v42 }
  0x1a   :  { %80 = vadd.xlane.f32.xlu1 %v79_v17  ;;  %1431 = vst [vmem:[#allocation16_spill] sm:$0xff] %v1055_v43  ;;  %1432 = vst [vmem:[#allocation17_spill] sm:$0xff] %v1057_v44  ;;  %v106_v47 = vadd.f32 %v1059_v45, %v1057_v44 }
  0x1b   :  { %1433 = vst [vmem:[#allocation18_spill] sm:$0xff] %v1059_v45 }
  0x1d   :  { %86 = vadd.xlane.f32.xlu0 %v85_v22 }
  0x1e   :  { %89 = vadd.xlane.f32.xlu1 %v88_v23 }
  0x21   :  { %71 = vadd.xlane.f32.xlu0 %v70_v28 }
  0x22   :  { %83 = vadd.xlane.f32.xlu1 %v82_v29 }
  0x25   :  { %92 = vadd.xlane.f32.xlu0 %v91_v34 }
  0x26   :  { %98 = vadd.xlane.f32.xlu1 %v97_v35 }
  0x29   :  { %101 = vadd.xlane.f32.xlu0 %v100_v40 }
  0x2a   :  { %95 = vadd.xlane.f32.xlu1 %v94_v41 }
  0x2d   :  { %104 = vadd.xlane.f32.xlu0 %v103_v46 }
  0x2e   :  { %107 = vadd.xlane.f32.xlu1 %v106_v47 }
  0x9a   :  { %v63_v48 = vpop.xlane.xlu0 %62 }
  0x9b   :  { %v125_v49 = vmul.f32 0.00390625, %v63_v48  ;;  %v75_v50 = vpop.xlane.xlu1 %74 }
  0x9c   :  { %v129_v51 = vmul.f32 0.00390625, %v75_v50 }
  0x9d   :  { %v141_v52 = vsub.f32 %v969_v0, %v125_v49  ;;  %v142_v53 = vsub.f32 %v971_v1, %v125_v49 }
  0x9e   :  { %v149_v54 = vsub.f32 %v973_v2, %v129_v51  ;;  %v150_v55 = vsub.f32 %v977_v4, %v129_v51  ;;  %v66_v56 = vpop.xlane.xlu0 %65 }
  0x9f   :  { %v173_v57 = vmul.f32 %v141_v52, %v141_v52  ;;  %v174_v58 = vmul.f32 %v142_v53, %v142_v53  ;;  %v126_v59 = vmul.f32 0.00390625, %v66_v56  ;;  %v78_v60 = vpop.xlane.xlu1 %77 }
  0xa0   :  { %v181_v61 = vmul.f32 %v149_v54, %v149_v54  ;;  %v182_v62 = vmul.f32 %v150_v55, %v150_v55  ;;  %v130_v63 = vmul.f32 0.00390625, %v78_v60 }
  0xa1   :  { %v143_v3 = vsub.f32 %v979_v5, %v126_v59  ;;  %v144_v7 = vsub.f32 %v981_v6, %v126_v59  ;;  %v205_v10 = vadd.f32 %v174_v58, %v173_v57 }
  0xa2   :  { %v151_v11 = vsub.f32 %v985_v8, %v130_v63  ;;  %v152_v16 = vsub.f32 %v987_v9, %v130_v63  ;;  %v69_v17 = vpop.xlane.xlu0 %68  ;;  %v217_v34 = vadd.f32 %v182_v62, %v181_v61 }
  0xa3   :  { %v175_v22 = vmul.f32 %v143_v3, %v143_v3  ;;  %v176_v23 = vmul.f32 %v144_v7, %v144_v7  ;;  %v127_v28 = vmul.f32 0.00390625, %v69_v17  ;;  %206 = vadd.xlane.f32.xlu0 %v205_v10  ;;  %v81_v29 = vpop.xlane.xlu1 %80 }
  0xa4   :  { %v183_v35 = vmul.f32 %v151_v11, %v151_v11  ;;  %v184_v40 = vmul.f32 %v152_v16, %v152_v16  ;;  %v131_v41 = vmul.f32 0.00390625, %v81_v29 }
  0xa5   :  { %v145_v46 = vsub.f32 %v993_v12, %v127_v28  ;;  %v146_v47 = vsub.f32 %v995_v13, %v127_v28  ;;  %v208_v48 = vadd.f32 %v176_v23, %v175_v22 }
  0xa6   :  { %v153_v49 = vsub.f32 %v997_v14, %v131_v41  ;;  %v154_v50 = vsub.f32 %v999_v15, %v131_v41  ;;  %v87_v51 = vpop.xlane.xlu0 %86  ;;  %v220_v56 = vadd.f32 %v184_v40, %v183_v35 }
  0xa7   :  { %v177_v52 = vmul.f32 %v145_v46, %v145_v46  ;;  %v178_v53 = vmul.f32 %v146_v47, %v146_v47  ;;  %v133_v54 = vmul.f32 0.00390625, %v87_v51  ;;  %218 = vadd.xlane.f32.xlu0 %v217_v34  ;;  %209 = vadd.xlane.f32.xlu1 %v208_v48  ;;  %v90_v55 = vpop.xlane.xlu1 %89 }
  0xa8   :  { %v185_v57 = vmul.f32 %v153_v49, %v153_v49  ;;  %v186_v58 = vmul.f32 %v154_v50, %v154_v50  ;;  %v134_v59 = vmul.f32 0.00390625, %v90_v55 }
  0xa9   :  { %v157_v60 = vsub.f32 %v1005_v18, %v133_v54  ;;  %v158_v61 = vsub.f32 %v1007_v19, %v133_v54  ;;  %v211_v62 = vadd.f32 %v178_v53, %v177_v52 }
  0xaa   :  { %v159_v63 = vsub.f32 %v1009_v20, %v134_v59  ;;  %v160_v3 = vsub.f32 %v1011_v21, %v134_v59  ;;  %v72_v7 = vpop.xlane.xlu0 %71  ;;  %v223_v22 = vadd.f32 %v186_v58, %v185_v57 }
  0xab   :  { %v189_v10 = vmul.f32 %v157_v60, %v157_v60  ;;  %v190_v11 = vmul.f32 %v158_v61, %v158_v61  ;;  %v128_v16 = vmul.f32 0.00390625, %v72_v7  ;;  %221 = vadd.xlane.f32.xlu1 %v220_v56  ;;  %212 = vadd.xlane.f32.xlu0 %v211_v62  ;;  %v84_v17 = vpop.xlane.xlu1 %83 }
  0xac   :  { %v191_v23 = vmul.f32 %v159_v63, %v159_v63  ;;  %v192_v28 = vmul.f32 %v160_v3, %v160_v3  ;;  %v132_v29 = vmul.f32 0.00390625, %v84_v17 }
  0xad   :  { %v147_v34 = vsub.f32 %v1017_v24, %v128_v16  ;;  %v148_v35 = vsub.f32 %v1019_v25, %v128_v16  ;;  %v229_v40 = vadd.f32 %v190_v11, %v189_v10 }
  0xae   :  { %v155_v41 = vsub.f32 %v1021_v26, %v132_v29  ;;  %v156_v46 = vsub.f32 %v1023_v27, %v132_v29  ;;  %v93_v47 = vpop.xlane.xlu0 %92  ;;  %v232_v52 = vadd.f32 %v192_v28, %v191_v23 }
  0xaf   :  { %v179_v48 = vmul.f32 %v147_v34, %v147_v34  ;;  %v180_v49 = vmul.f32 %v148_v35, %v148_v35  ;;  %v135_v50 = vmul.f32 0.00390625, %v93_v47  ;;  %224 = vadd.xlane.f32.xlu1 %v223_v22  ;;  %230 = vadd.xlane.f32.xlu0 %v229_v40  ;;  %v99_v51 = vpop.xlane.xlu1 %98 }
  0xb0   :  { %v187_v53 = vmul.f32 %v155_v41, %v155_v41  ;;  %v188_v54 = vmul.f32 %v156_v46, %v156_v46  ;;  %v137_v55 = vmul.f32 0.00390625, %v99_v51 }
  0xb1   :  { %v161_v56 = vsub.f32 %v1029_v30, %v135_v50  ;;  %v162_v57 = vsub.f32 %v1031_v31, %v135_v50  ;;  %v214_v58 = vadd.f32 %v180_v49, %v179_v48 }
  0xb2   :  { %v165_v59 = vsub.f32 %v1033_v32, %v137_v55  ;;  %v166_v60 = vsub.f32 %v1035_v33, %v137_v55  ;;  %v102_v61 = vpop.xlane.xlu0 %101  ;;  %v226_v10 = vadd.f32 %v188_v54, %v187_v53 }
  0xb3   :  { %v193_v62 = vmul.f32 %v161_v56, %v161_v56  ;;  %v194_v63 = vmul.f32 %v162_v57, %v162_v57  ;;  %v138_v3 = vmul.f32 0.00390625, %v102_v61  ;;  %233 = vadd.xlane.f32.xlu1 %v232_v52  ;;  %215 = vadd.xlane.f32.xlu0 %v214_v58  ;;  %v96_v7 = vpop.xlane.xlu1 %95 }
  0xb4   :  { %v197_v11 = vmul.f32 %v165_v59, %v165_v59  ;;  %v198_v16 = vmul.f32 %v166_v60, %v166_v60  ;;  %v136_v17 = vmul.f32 0.00390625, %v96_v7  ;;  %v940_v7 = vmov 0.0  }
  0xb5   :  { %v167_v22 = vsub.f32 %v1041_v36, %v138_v3  ;;  %v168_v23 = vsub.f32 %v1043_v37, %v138_v3  ;;  %v235_v28 = vadd.f32 %v194_v63, %v193_v62  ;;  %v401_v3 = vld [vmem:[%s1409_s1 + $0x18] sm:$0xff]  ;;  %835 = vmatprep.subr.mxu0 %v940_v7  ;;  %843 = vmatprep.mubr.msk.f32.mxu0 %vm941_vm0, %v940_v7 }
  0xb6   :  { %v163_v29 = vsub.f32 %v1045_v38, %v136_v17  ;;  %v164_v34 = vsub.f32 %v1047_v39, %v136_v17  ;;  %v105_v35 = vpop.xlane.xlu0 %104  ;;  %v241_v48 = vadd.f32 %v198_v16, %v197_v11  ;;  %836 = vmatpush3.msra.mxu0 %v401_v3  ;;  %846 = vmatprep.subr.mxu1 %v940_v7  ;;  %v399_v11 = vld [vmem:[%s1409_s1 + $0x8] sm:$0xff]  ;;  %v398_v16 = vld [vmem:[%s1409_s1] sm:$0xff] }
  0xb7   :  { %v199_v40 = vmul.f32 %v167_v22, %v167_v22  ;;  %v200_v41 = vmul.f32 %v168_v23, %v168_v23  ;;  %v139_v46 = vmul.f32 0.00390625, %v105_v35  ;;  %227 = vadd.xlane.f32.xlu1 %v226_v10  ;;  %236 = vadd.xlane.f32.xlu0 %v235_v28  ;;  %v108_v47 = vpop.xlane.xlu1 %107  ;;  %v400_v10 = vld [vmem:[%s1409_s1 + $0x10] sm:$0xff] }
  0xb8   :  { %v195_v49 = vmul.f32 %v163_v29, %v163_v29  ;;  %v196_v50 = vmul.f32 %v164_v34, %v164_v34  ;;  %v140_v51 = vmul.f32 0.00390625, %v108_v47  ;;  %837 = vmatprep.subr.mxu0 %v940_v7  ;;  %848 = vmatprep.mubr.msk.f32.mxu1 %vm941_vm0, %v940_v7 }
  0xb9   :  { %v169_v52 = vsub.f32 %v1053_v42, %v139_v46  ;;  %v170_v53 = vsub.f32 %v1055_v43, %v139_v46  ;;  %v244_v54 = vadd.f32 %v200_v41, %v199_v40  ;;  %838 = vmatpush3.msra.mxu0 %v400_v10 }
  0xba   :  { %v171_v55 = vsub.f32 %v1057_v44, %v140_v51  ;;  %v172_v56 = vsub.f32 %v1059_v45, %v140_v51  ;;  %v238_v59 = vadd.f32 %v196_v50, %v195_v49  ;;  %839 = vmatprep.subr.mxu0 %v940_v7  ;;  %v418_v49 = vlaneseq }
  0xbb   :  { %v201_v57 = vmul.f32 %v169_v52, %v169_v52  ;;  %v202_v58 = vmul.f32 %v170_v53, %v170_v53  ;;  %242 = vadd.xlane.f32.xlu1 %v241_v48  ;;  %245 = vadd.xlane.f32.xlu0 %v244_v54 }
  0xbc   :  { %v203_v60 = vmul.f32 %v171_v55, %v171_v55  ;;  %v204_v61 = vmul.f32 %v172_v56, %v172_v56  ;;  %840 = vmatpush3.msra.mxu0 %v399_v11  ;;  %v419_v54 = vand.u32 127, %v418_v49 }
  0xbd   :  { %v247_v62 = vadd.f32 %v202_v58, %v201_v57  ;;  %841 = vmatprep.subr.mxu0 %v940_v7  ;;  %v1134_v58 = vshrl.u32 %v418_v49, 7 }
  0xbe   :  { %v250_v63 = vadd.f32 %v204_v61, %v203_v60  ;;  %842 = vmatpush3.msra.mxu0 %v398_v16  ;;  %v431_v60 = vadd.s32 4294967280, %v419_v54  ;;  %v438_v61 = vadd.s32 4294967272, %v419_v54 }
  0xbf   :  { %239 = vadd.xlane.f32.xlu1 %v238_v59  ;;  %248 = vadd.xlane.f32.xlu0 %v247_v62  ;;  %v424_v59 = vadd.s32 4294967288, %v419_v54  ;;  %v1144_v11 = vsub.s32 %v419_v54, %v1134_v58 }
  0xc1   :  { %v1147_v16 = vsub.s32 %v424_v59, %v1134_v58 }
  0xc3   :  { %251 = vadd.xlane.f32.xlu1 %v250_v63 }
 0x12c   :  { %v207_v17 = vpop.xlane.xlu0 %206 }
 0x12d   :  { %v1109_v22 = vmul.f32 0.003921569, %v207_v17  ;;  %v1150_v17 = vsub.s32 %v431_v60, %v1134_v58 }
 0x12f   :  { %857 = vrsqrt.f32 %v1109_v22  ;;  %vm288_vm1 = vcmp.eq.f32.partialorder %v1109_v22, inf  ;;  %vm290_vm2 = vcmp.eq.f32.partialorder %v1109_v22, 0.0 }
 0x130   :  { %v210_v23 = vpop.xlane.xlu1 %209  ;;  %v219_v28 = vpop.xlane.xlu0 %218 }
 0x131   :  { %v1112_v29 = vmul.f32 0.003921569, %v210_v23  ;;  %v1114_v34 = vmul.f32 0.003921569, %v219_v28  ;;  %v1153_v23 = vsub.s32 %v438_v61, %v1134_v58 }
 0x133   :  { %859 = vrsqrt.f32 %v1112_v29  ;;  %vm295_vm3 = vcmp.eq.f32.partialorder %v1112_v29, inf  ;;  %vm316_vm4 = vcmp.eq.f32.partialorder %v1114_v34, inf  ;;  %vm297_vm5 = vcmp.eq.f32.partialorder %v1112_v29, 0.0 }
 0x134   :  { %v222_v35 = vpop.xlane.xlu1 %221  ;;  %v213_v40 = vpop.xlane.xlu0 %212  ;;  %861 = vrsqrt.f32 %v1114_v34  ;;  %vm318_vm6 = vcmp.eq.f32.partialorder %v1114_v34, 0.0 }
 0x135   :  { %v1116_v41 = vmul.f32 0.003921569, %v222_v35  ;;  %v1119_v46 = vmul.f32 0.003921569, %v213_v40  ;;  %v291_v35 = vand.u32 2147483648, %v1109_v22 }
 0x137   :  { %863 = vrsqrt.f32 %v1116_v41  ;;  %vm323_vm7 = vcmp.eq.f32.partialorder %v1116_v41, inf  ;;  %vm302_vm8 = vcmp.eq.f32.partialorder %v1119_v46, inf  ;;  %vm325_vm10 = vcmp.eq.f32.partialorder %v1116_v41, 0.0 }
 0x138   :  { %v225_v47 = vpop.xlane.xlu1 %224  ;;  %v231_v48 = vpop.xlane.xlu0 %230  ;;  %865 = vrsqrt.f32 %v1119_v46  ;;  %vm304_vm11 = vcmp.eq.f32.partialorder %v1119_v46, 0.0 }
 0x139   :  { %v1123_v50 = vmul.f32 0.003921569, %v225_v47  ;;  %v1125_v51 = vmul.f32 0.003921569, %v231_v48  ;;  %v298_v47 = vand.u32 2147483648, %v1112_v29 }
 0x13b   :  { %867 = vrsqrt.f32 %v1123_v50  ;;  %vm330_vm9 = vcmp.eq.f32.partialorder %v1123_v50, inf  ;;  %vm344_vm12 = vcmp.eq.f32.partialorder %v1125_v51, inf  ;;  %v347_v61 = vand.u32 2147483648, %v1125_v51 }
 0x13c   :  { %v234_v52 = vpop.xlane.xlu1 %233  ;;  %v216_v53 = vpop.xlane.xlu0 %215  ;;  %869 = vrsqrt.f32 %v1125_v51  ;;  %vm332_vm13 = vcmp.eq.f32.partialorder %v1123_v50, 0.0  ;;  %vm346_vm15 = vcmp.eq.f32.partialorder %v1125_v51, 0.0 }
 0x13d   :  { %v1130_v55 = vmul.f32 0.003921569, %v234_v52  ;;  %v1132_v56 = vmul.f32 0.003921569, %v216_v53  ;;  %v858_v57 = vpop.eup %857  ;;  %v319_v53 = vand.u32 2147483648, %v1114_v34 }
 0x13e   :  { %v287_v3 = vmul.f32 %v858_v57, %v1109_v22 }
 0x13f   :  { %871 = vrsqrt.f32 %v1130_v55  ;;  %vm309_vm14 = vcmp.eq.f32.partialorder %v1132_v56, inf  ;;  %vm351_vm0 = vcmp.eq.f32.partialorder %v1130_v55, inf }
 0x140   :  { %873 = vrsqrt.f32 %v1132_v56  ;;  %v228_v62 = vpop.xlane.xlu1 %227  ;;  %v237_v63 = vpop.xlane.xlu0 %236  ;;  %v289_v52 = vsel %vm288_vm1, %v1109_v22, %v287_v3  ;;  %v312_v22 = vand.u32 2147483648, %v1132_v56 }
 0x141   :  { %v1139_v7 = vmul.f32 0.003921569, %v228_v62  ;;  %v1141_v10 = vmul.f32 0.003921569, %v237_v63  ;;  %v860_v28 = vpop.eup %859 }
 0x142   :  { %v862_v40 = vpop.eup %861  ;;  %v294_v63 = vmul.f32 %v860_v28, %v1112_v29  ;;  %v1186_v28 = vsel %vm290_vm2, %v291_v35, %v289_v52 }
 0x143   :  { %875 = vrsqrt.f32 %v1139_v7  ;;  %v315_v3 = vmul.f32 %v862_v40, %v1114_v34  ;;  %vm337_vm1 = vcmp.eq.f32.partialorder %v1139_v7, inf  ;;  %vm358_vm2 = vcmp.eq.f32.partialorder %v1141_v10, inf }
 0x144   :  { %877 = vrsqrt.f32 %v1141_v10  ;;  %v243_v48 = vpop.xlane.xlu1 %242  ;;  %v246_v49 = vpop.xlane.xlu0 %245  ;;  %v296_v35 = vsel %vm295_vm3, %v1112_v29, %v294_v63  ;;  %v340_v63 = vand.u32 2147483648, %v1139_v7  ;;  %v361_v39 = vand.u32 2147483648, %v1141_v10 }
 0x145   :  { %v1167_v54 = vmul.f32 0.003921569, %v243_v48  ;;  %v1169_v57 = vmul.f32 0.003921569, %v246_v49  ;;  %v864_v59 = vpop.eup %863  ;;  %v333_v48 = vand.u32 2147483648, %v1123_v50  ;;  %v317_v52 = vsel %vm316_vm4, %v1114_v34, %v315_v3 }
 0x146   :  { %v866_v62 = vpop.eup %865  ;;  %v322_v43 = vmul.f32 %v864_v59, %v1116_v41  ;;  %vm353_vm4 = vcmp.eq.f32.partialorder %v1130_v55, 0.0 }
 0x147   :  { %879 = vrsqrt.f32 %v1167_v54  ;;  %v301_v42 = vmul.f32 %v866_v62, %v1119_v46  ;;  %vm372_vm3 = vcmp.eq.f32.partialorder %v1167_v54, inf }
 0x148   :  { %881 = vrsqrt.f32 %v1169_v57  ;;  %v240_v49 = vpop.xlane.xlu1 %239  ;;  %v249_v60 = vpop.xlane.xlu0 %248 }
 0x149   :  { %v868_v40 = vpop.eup %867  ;;  %v1190_v44 = vmul.f32 0.003921569, %v240_v49  ;;  %v1192_v37 = vmul.f32 0.003921569, %v249_v60  ;;  %v303_v59 = vsel %vm302_vm8, %v1119_v46, %v301_v42  ;;  %vm360_vm8 = vcmp.eq.f32.partialorder %v1141_v10, 0.0 }
 0x14a   :  { %v870_v36 = vpop.eup %869  ;;  %v329_v62 = vmul.f32 %v868_v40, %v1123_v50  ;;  %v324_v40 = vsel %vm323_vm7, %v1116_v41, %v322_v43  ;;  %v375_v43 = vand.u32 2147483648, %v1167_v54  ;;  %vm339_vm7 = vcmp.eq.f32.partialorder %v1139_v7, 0.0 }
 0x14b   :  { %883 = vrsqrt.f32 %v1190_v44  ;;  %v343_v45 = vmul.f32 %v870_v36, %v1125_v51  ;;  %v1229_v36 = vsel %vm297_vm5, %v298_v47, %v296_v35  ;;  %vm379_vm5 = vcmp.eq.f32.partialorder %v1169_v57, inf }
 0x14c   :  { %v872_v60 = vpop.eup %871  ;;  %885 = vrsqrt.f32 %v1192_v37  ;;  %v252_v49 = vpop.xlane.xlu1 %251  ;;  %v331_v29 = vsel %vm330_vm9, %v1123_v50, %v329_v62  ;;  %v382_v47 = vand.u32 2147483648, %v1169_v57  ;;  %v1435_v62 = vand.u32 2147483648, %v1116_v41 }
 0x14d   :  { %v874_v3 = vpop.eup %873  ;;  %v1217_v38 = vmul.f32 0.003921569, %v252_v49  ;;  %v1233_v49 = vsel %vm318_vm6, %v319_v53, %v317_v52  ;;  %v350_v34 = vmul.f32 %v872_v60, %v1130_v55  ;;  %v345_v35 = vsel %vm344_vm12, %v1125_v51, %v343_v45 }
 0x14e   :  { %v308_v33 = vmul.f32 %v874_v3, %v1132_v56  ;;  %v1434_v3 = vand.u32 2147483648, %v1119_v46  ;;  %v327_v60 = vsel %vm325_vm10, %v1435_v62, %v324_v40  ;;  %vm374_vm9 = vcmp.eq.f32.partialorder %v1167_v54, 0.0 }
 0x14f   :  { %887 = vrsqrt.f32 %v1217_v38  ;;  %vm381_vm12 = vcmp.eq.f32.partialorder %v1169_v57, 0.0  ;;  %v334_v46 = vsel %vm332_vm13, %v333_v48, %v331_v29  ;;  %v368_v41 = vand.u32 2147483648, %v1190_v44 }
 0x150   :  { %v876_v42 = vpop.eup %875  ;;  %v1255_v32 = vsel %vm304_vm11, %v1434_v3, %v303_v59  ;;  %v310_v45 = vsel %vm309_vm14, %v1132_v56, %v308_v33  ;;  %vm367_vm11 = vcmp.eq.f32.partialorder %v1190_v44, 0.0  ;;  %vm429_vm10 = vcmask 130112  }
 0x151   :  { %v878_v53 = vpop.eup %877  ;;  %v336_v52 = vmul.f32 %v876_v42, %v1139_v7  ;;  %v352_v40 = vsel %vm351_vm0, %v1130_v55, %v350_v34  ;;  %v348_v42 = vsel %vm346_vm15, %v347_v61, %v345_v35  ;;  %vm386_vm6 = vcmp.eq.f32.partialorder %v1192_v37, inf }
 0x152   :  { %v357_v21 = vmul.f32 %v878_v53, %v1141_v10  ;;  %v389_v34 = vand.u32 2147483648, %v1192_v37  ;;  %vm436_vm13 = vcmask 195712   ;;  %vm1436_vm15 = vcmp.eq.f32.partialorder %v1132_v56, 0.0 }
 0x153   :  { %v338_v48 = vsel %vm337_vm1, %v1139_v7, %v336_v52  ;;  %v313_v61 = vsel %vm1436_vm15, %v312_v22, %v310_v45  ;;  %vm393_vm0 = vcmp.eq.f32.partialorder %v1217_v38, inf  ;;  %v428_v53 = vrot.slane %v1229_v36, %v1147_v16 }
 0x154   :  { %v880_v59 = vpop.eup %879  ;;  %v359_v29 = vsel %vm358_vm2, %v1141_v10, %v357_v21  ;;  %vm443_vm14 = vcmask 261312   ;;  %v1437_v35 = vand.u32 2147483648, %v1130_v55  ;;  %vm395_vm1 = vcmp.eq.f32.partialorder %v1217_v38, 0.0 }
 0x155   :  { %v882_v33 = vpop.eup %881  ;;  %v371_v50 = vmul.f32 %v880_v59, %v1167_v54  ;;  %v435_v56 = vrot.slane %v1255_v32, %v1150_v17  ;;  %vm502_vm2 = vcmask 1041409   ;;  %v341_v36 = vsel %vm339_vm7, %v340_v63, %v338_v48 }
 0x156   :  { %v378_v51 = vmul.f32 %v882_v33, %v1169_v57  ;;  %v355_v52 = vsel %vm353_vm4, %v1437_v35, %v352_v40  ;;  %v362_v3 = vsel %vm360_vm8, %v361_v39, %v359_v29  ;;  %v452_v62 = vrot.slane %v327_v60, %v1147_v16 }
 0x157   :  { %v373_v21 = vsel %vm372_vm3, %v1167_v54, %v371_v50  ;;  %v442_v40 = vrot.slane %v313_v61, %v1153_v23  ;;  %v448_v7 = vrot.slane %v1233_v49, %v1144_v11  ;;  %v457_v63 = vrot.slane %v334_v46, %v1150_v17 }
 0x158   :  { %v884_v22 = vpop.eup %883  ;;  %v380_v55 = vsel %vm379_vm5, %v1169_v57, %v378_v51  ;;  %v376_v32 = vsel %vm374_vm9, %v375_v43, %v373_v21  ;;  %v471_v60 = vrot.slane %v355_v52, %v1147_v16  ;;  %vm1438_vm3 = vcmp.eq.f32.partialorder %v1190_v44, inf }
 0x159   :  { %v886_v45 = vpop.eup %885  ;;  %v364_v59 = vmul.f32 %v884_v22, %v1190_v44  ;;  %v383_v39 = vsel %vm381_vm12, %v382_v47, %v380_v55  ;;  %v462_v54 = vrot.slane %v341_v36, %v1153_v23  ;;  %v467_v43 = vrot.slane %v348_v42, %v1144_v11 }
 0x15a   :  { %v385_v10 = vmul.f32 %v886_v45, %v1192_v37  ;;  %v476_v50 = vrot.slane %v362_v3, %v1150_v17  ;;  %v453_v47 = vsel %vm429_vm10, %v452_v62, %v448_v7  ;;  %v486_v46 = vrot.slane %v376_v32, %v1144_v11 }
 0x15b   :  { %v366_v33 = vsel %vm1438_vm3, %v1190_v44, %v364_v59  ;;  %vm1439_vm4 = vcmp.eq.f32.partialorder %v1192_v37, 0.0  ;;  %v490_v61 = vrot.slane %v383_v39, %v1147_v16  ;;  %v396_v44 = vand.u32 2147483648, %v1217_v38 }
 0x15c   :  { %v888_v49 = vpop.eup %887  ;;  %v369_v48 = vsel %vm367_vm11, %v368_v41, %v366_v33  ;;  %v387_v57 = vsel %vm386_vm6, %v1192_v37, %v385_v10  ;;  %v458_v41 = vsel %vm436_vm13, %v457_v63, %v453_v47  ;;  %v472_v35 = vsel %vm429_vm10, %v471_v60, %v467_v43 }
 0x15d   :  { %v390_v29 = vsel %vm1439_vm4, %v389_v34, %v387_v57  ;;  %v392_v51 = vmul.f32 %v888_v49, %v1217_v38  ;;  %v481_v42 = vrot.slane %v369_v48, %v1153_v23  ;;  %v1440_v37 = vrot.slane %v1186_v28, %v1144_v11 }
 0x15e   :  { %v495_v52 = vrot.slane %v390_v29, %v1150_v17  ;;  %v463_v22 = vsel %vm443_vm14, %v462_v54, %v458_v41  ;;  %v477_v16 = vsel %vm436_vm13, %v476_v50, %v472_v35  ;;  %vm504_vm7 = vcmask 1042434  }
 0x15f   :  { %v394_v21 = vsel %vm393_vm0, %v1217_v38, %v392_v51  ;;  %v430_v34 = vsel %vm429_vm10, %v428_v53, %v1440_v37  ;;  %v482_v17 = vsel %vm443_vm14, %v481_v42, %v477_v16  ;;  %v491_v62 = vsel %vm429_vm10, %v490_v61, %v486_v46 }
 0x160   :  { %v397_v36 = vsel %vm395_vm1, %v396_v44, %v394_v21  ;;  %v437_v3 = vsel %vm436_vm13, %v435_v56, %v430_v34  ;;  %vm506_vm8 = vcmask 1043459   ;;  %v496_v28 = vsel %vm436_vm13, %v495_v52, %v491_v62  ;;  %v582_v56 = vld [vmem:[%s1410_s2] sm:$0x3]  ;;  %s942_s2 = smov [#allocation5]  }
 0x161   :  { %v444_v55 = vsel %vm443_vm14, %v442_v40, %v437_v3  ;;  %v500_v11 = vrot.slane %v397_v36, %v1153_v23  ;;  %vm508_vm5 = vcmask 261120   ;;  %vm587_vm6 = vcmask 1041408   ;;  %s812_s27 = sshll.u32 %s942_s2, 4  ;;  %s813_s27 = int_to_ptr.vmem [resolvable:$true] %s812_s27 }
 0x162   :  { %v503_v53 = vsel %vm502_vm2, %v463_v22, %v444_v55  ;;  %847 = vmatpush3.msk.msra.mxu1 %vm587_vm6, %v582_v56  ;;  %vm583_vm9 = vcmask 15360   ;;  %v669_v33 = vsub.s32 0, %v1134_v58  ;;  %v688_v50 = vsub.s32 1, %v1134_v58  ;;  %v1441_v55 = vld [vmem:[#allocation8_spill] sm:$0xff]  ;;  %v1446_v56 = vld [vmem:[#allocation15_spill] sm:$0xff]  ;;  %s913_s28 = scalar_lea.vmem %s813_s27, 4096  ;;  %p918_p6 = scmp.lt.s32.totalorder %s813_s27, %s813_s27 }
 0x163   :  { %v501_v38 = vsel %vm443_vm14, %v500_v11, %v496_v28  ;;  %v505_v45 = vsel %vm504_vm7, %v482_v17, %v503_v53  ;;  %v707_v48 = vsub.s32 2, %v1134_v58  ;;  %v726_v47 = vsub.s32 3, %v1134_v58  ;;  %v1442_v11 = vld [vmem:[#allocation9_spill] sm:$0xff]  ;;  %v1443_v53 = vld [vmem:[#allocation10_spill] sm:$0xff]  ;;  %p914_p5 = scmp.ne.s32.totalorder %s813_s27, %s913_s28  ;;  %p919_p7 = scmp.lt.s32.totalorder %s913_s28, %s913_s28 }
 0x164   :  { %v507_v59 = vsel %vm506_vm8, %v501_v38, %v505_v45  ;;  %v1445_v45 = vld [vmem:[#allocation14_spill] sm:$0xff] }
 0x165   :  { %844 = vmatmul.mubr.msk.f32.vlgmr.msra.gmra.mxu0 %vm508_vm5, %v507_v59  ;;  %p920_p8 = por %p919_p7, %p918_p6 }
 0x167   :  { %p921_p9 = pnand %p920_p8, %p914_p5 }
 0x225   :  { %v577_v32 = vpop.f32.mrf.mxu0 }
 0x226   :  { %v581_v23 = vmax.f32 %v577_v32, 0.0 }
 0x227   :  { %v845_v40 = vpop.f32.mrf.mxu0 }
 0x228   :  { %849 = vmatmul.mubr.msk.f32.vlgmr.msra.gmra.mxu1 %vm583_vm9, %v581_v23  ;;  %v1447_v23 = vld [vmem:[#allocation16_spill] sm:$0xff] }
 0x2e8   :  { %v657_v7 = vpop.f32.mrf.mxu1 }
 0x2e9   :  { %v827_v10 = vmul.f32 -1.442695, %v657_v7  ;;  %v1448_v7 = vld [vmem:[#allocation11_spill] sm:$0xff] }
 0x2ea   :  { %v850_v39 = vpop.f32.mrf.mxu1 }
 0x2eb   :  { %889 = vpow2.f32 %v827_v10  ;;  %v1449_v39 = vld [vmem:[#allocation12_spill] sm:$0xff] }
 0x2f8   :  { %v890_v63 = vpop.eup %889 }
 0x2f9   :  { %v664_v60 = vadd.f32 1.0, %v890_v63 }
 0x2fb   :  { %891 = vrcp.f32 %v664_v60 }
 0x308   :  { %v892_v54 = vpop.eup %891 }
 0x309   :  { %v670_v43 = vrot.slane %v892_v54, %v669_v33  ;;  %v689_v49 = vrot.slane %v892_v54, %v688_v50  ;;  %v708_v57 = vrot.slane %v892_v54, %v707_v48  ;;  %v727_v46 = vrot.slane %v892_v54, %v726_v47  ;;  %v1450_v33 = vld [vmem:[#allocation17_spill] sm:$0xff] }
 0x30b   :  { %676 = vbcast.lane.b32.xlu1 %v670_v43, 264  ;;  %672 = vbcast.lane.b32.xlu0 %v670_v43, 256 }
 0x30f   :  { %680 = vbcast.lane.b32.xlu1 %v670_v43, 272  ;;  %691 = vbcast.lane.b32.xlu0 %v689_v49, 256 }
 0x313   :  { %684 = vbcast.lane.b32.xlu1 %v670_v43, 280  ;;  %699 = vbcast.lane.b32.xlu0 %v689_v49, 272  ;;  %v1451_v43 = vld [vmem:[#allocation18_spill] sm:$0xff] }
 0x317   :  { %695 = vbcast.lane.b32.xlu1 %v689_v49, 264  ;;  %710 = vbcast.lane.b32.xlu0 %v708_v57, 256 }
 0x31b   :  { %703 = vbcast.lane.b32.xlu1 %v689_v49, 280  ;;  %718 = vbcast.lane.b32.xlu0 %v708_v57, 272 }
 0x31f   :  { %714 = vbcast.lane.b32.xlu1 %v708_v57, 264  ;;  %729 = vbcast.lane.b32.xlu0 %v727_v46, 256 }
 0x323   :  { %722 = vbcast.lane.b32.xlu1 %v708_v57, 280  ;;  %737 = vbcast.lane.b32.xlu0 %v727_v46, 272 }
 0x327   :  { %733 = vbcast.lane.b32.xlu1 %v727_v46, 264 }
 0x32b   :  { %741 = vbcast.lane.b32.xlu1 %v727_v46, 280 }
 0x37d   :  { %v677_v29 = vpop.permute.xlu1 %676  ;;  %v673_v51 = vpop.permute.xlu0 %672 }
 0x37e   :  { %v745_v42 = vmul.f32 %v677_v29, %v979_v5  ;;  %v746_v61 = vmul.f32 %v677_v29, %v981_v6  ;;  %v743_v44 = vmul.f32 %v673_v51, %v969_v0  ;;  %v744_v41 = vmul.f32 %v673_v51, %v971_v1 }
 0x380   :  { %777 = vst [vmem:[#allocation5 + $0x10] sm:$0xff] %v745_v42  ;;  %778 = vst [vmem:[#allocation5 + $0x18] sm:$0xff] %v746_v61 }
 0x381   :  { %775 = vst [vmem:[#allocation5] sm:$0xff] %v743_v44  ;;  %776 = vst [vmem:[#allocation5 + $0x8] sm:$0xff] %v744_v41  ;;  %v681_v58 = vpop.permute.xlu1 %680  ;;  %v692_v35 = vpop.permute.xlu0 %691 }
 0x382   :  { %v747_v52 = vmul.f32 %v681_v58, %v993_v12  ;;  %v748_v21 = vmul.f32 %v681_v58, %v995_v13  ;;  %v751_v37 = vmul.f32 %v692_v35, %v973_v2  ;;  %v752_v5 = vmul.f32 %v692_v35, %v977_v4 }
 0x384   :  { %779 = vst [vmem:[#allocation5 + $0x20] sm:$0xff] %v747_v52  ;;  %780 = vst [vmem:[#allocation5 + $0x28] sm:$0xff] %v748_v21 }
 0x385   :  { %783 = vst [vmem:[#allocation5 + $0x40] sm:$0xff] %v751_v37  ;;  %784 = vst [vmem:[#allocation5 + $0x48] sm:$0xff] %v752_v5  ;;  %v685_v0 = vpop.permute.xlu1 %684  ;;  %v700_v1 = vpop.permute.xlu0 %699 }
 0x386   :  { %v749_v6 = vmul.f32 %v685_v0, %v1017_v24  ;;  %v750_v34 = vmul.f32 %v685_v0, %v1019_v25  ;;  %v755_v22 = vmul.f32 %v700_v1, %v997_v14  ;;  %v756_v12 = vmul.f32 %v700_v1, %v999_v15 }
 0x388   :  { %781 = vst [vmem:[#allocation5 + $0x30] sm:$0xff] %v749_v6  ;;  %782 = vst [vmem:[#allocation5 + $0x38] sm:$0xff] %v750_v34 }
 0x389   :  { %787 = vst [vmem:[#allocation5 + $0x60] sm:$0xff] %v755_v22  ;;  %788 = vst [vmem:[#allocation5 + $0x68] sm:$0xff] %v756_v12  ;;  %v696_v2 = vpop.permute.xlu1 %695  ;;  %v711_v4 = vpop.permute.xlu0 %710 }
 0x38a   :  { %v753_v13 = vmul.f32 %v696_v2, %v985_v8  ;;  %v754_v16 = vmul.f32 %v696_v2, %v987_v9  ;;  %v759_v36 = vmul.f32 %v711_v4, %v1005_v18  ;;  %v760_v24 = vmul.f32 %v711_v4, %v1007_v19 }
 0x38c   :  { %785 = vst [vmem:[#allocation5 + $0x50] sm:$0xff] %v753_v13  ;;  %786 = vst [vmem:[#allocation5 + $0x58] sm:$0xff] %v754_v16 }
 0x38d   :  { %791 = vst [vmem:[#allocation5 + $0x80] sm:$0xff] %v759_v36  ;;  %792 = vst [vmem:[#allocation5 + $0x88] sm:$0xff] %v760_v24  ;;  %v704_v14 = vpop.permute.xlu1 %703  ;;  %v719_v15 = vpop.permute.xlu0 %718 }
 0x38e   :  { %v757_v25 = vmul.f32 %v704_v14, %v1021_v26  ;;  %v758_v3 = vmul.f32 %v704_v14, %v1023_v27  ;;  %v763_v17 = vmul.f32 %v719_v15, %v1029_v30  ;;  %v764_v8 = vmul.f32 %v719_v15, %v1031_v31  ;;  %v1444_v31 = vld [vmem:[#allocation13_spill] sm:$0xff] }
 0x390   :  { %789 = vst [vmem:[#allocation5 + $0x70] sm:$0xff] %v757_v25  ;;  %790 = vst [vmem:[#allocation5 + $0x78] sm:$0xff] %v758_v3 }
 0x391   :  { %795 = vst [vmem:[#allocation5 + $0xa0] sm:$0xff] %v763_v17  ;;  %796 = vst [vmem:[#allocation5 + $0xa8] sm:$0xff] %v764_v8  ;;  %v715_v9 = vpop.permute.xlu1 %714  ;;  %v730_v18 = vpop.permute.xlu0 %729 }
 0x392   :  { %v761_v19 = vmul.f32 %v715_v9, %v1009_v20  ;;  %v762_v62 = vmul.f32 %v715_v9, %v1441_v55  ;;  %v767_v28 = vmul.f32 %v730_v18, %v1442_v11  ;;  %v768_v26 = vmul.f32 %v730_v18, %v1443_v53 }
 0x394   :  { %793 = vst [vmem:[#allocation5 + $0x90] sm:$0xff] %v761_v19  ;;  %794 = vst [vmem:[#allocation5 + $0x98] sm:$0xff] %v762_v62 }
 0x395   :  { %799 = vst [vmem:[#allocation5 + $0xc0] sm:$0xff] %v767_v28  ;;  %800 = vst [vmem:[#allocation5 + $0xc8] sm:$0xff] %v768_v26  ;;  %v723_v27 = vpop.permute.xlu1 %722  ;;  %v738_v30 = vpop.permute.xlu0 %737 }
 0x396   :  { %v765_v38 = vmul.f32 %v723_v27, %v1444_v31  ;;  %v766_v59 = vmul.f32 %v723_v27, %v1445_v45  ;;  %v771_v32 = vmul.f32 %v738_v30, %v1446_v56  ;;  %v772_v20 = vmul.f32 %v738_v30, %v1447_v23 }
 0x398   :  { %797 = vst [vmem:[#allocation5 + $0xb0] sm:$0xff] %v765_v38  ;;  %798 = vst [vmem:[#allocation5 + $0xb8] sm:$0xff] %v766_v59 }
 0x399   :  { %803 = vst [vmem:[#allocation5 + $0xe0] sm:$0xff] %v771_v32  ;;  %804 = vst [vmem:[#allocation5 + $0xe8] sm:$0xff] %v772_v20  ;;  %v734_v40 = vpop.permute.xlu1 %733 }
 0x39a   :  { %v769_v10 = vmul.f32 %v734_v40, %v1448_v7  ;;  %v770_v63 = vmul.f32 %v734_v40, %v1449_v39 }
 0x39c   :  { %801 = vst [vmem:[#allocation5 + $0xd0] sm:$0xff] %v769_v10  ;;  %802 = vst [vmem:[#allocation5 + $0xd8] sm:$0xff] %v770_v63 }
 0x39d   :  { %v742_v60 = vpop.permute.xlu1 %741 }
 0x39e   :  { %v773_v54 = vmul.f32 %v742_v60, %v1450_v33  ;;  %v774_v50 = vmul.f32 %v742_v60, %v1451_v43 }
 0x3a0   :  { %805 = vst [vmem:[#allocation5 + $0xf0] sm:$0xff] %v773_v54  ;;  %806 = vst [vmem:[#allocation5 + $0xf8] sm:$0xff] %v774_v50 }
 0x3a1   :  { %924 = shalt.err (!%p921_p9)
}
 0x3a2   :  { %818 = dma.vmem_to_hbm [thread:$0]  %s813_s27, 4096, %s1411_s3, [#allocation4], %s938_s15, %s938_s15, %s939_s16  }
 0x3a3   :  { %935 = dma.done.wait [#allocation4], 4096  }
 0x3a4   :  { %936 = vsyncadd [#allocation4], 4294963200 }
 0x3a5   :  { %822 = vsyncpa [#allocation3], 1 }
 0x3a6   :  { %823 = vsyncpa [#allocation4], 1 }

</bundles_post_ra>
